<compile_context>
chip_gen: v7x
topology: tpu7x:2x2x1
jax: 0.10.0
libtpu: 0.0.40
codegen_flags: <defaults>
</compile_context>

<pallas_src>
import functools

import jax
import jax.numpy as jnp
import numpy as np
from jax import lax
from jax.experimental import pallas as pl
from jax.experimental.pallas import tpu as pltpu


def _align8(r):
    return (r + 7) // 8 * 8


def _cnn1d_kernel(x_ref, slab_ref, out_ref, *, B, L2, L1, nv, C1, C2, offs):
    f32 = jnp.float32
    n = B * L2
    (R_W1B, R_W1T0, R_B1, R_W2LO, R_W2MID, R_W2HI, R_B2, R_FCW, R_FCB) = offs

    x = x_ref[...]                                              # (n, 4*nv) f32

    # ---- conv1 (k=3, s=2, p=1): one combined matmul + one shifted tap ------
    # Slab rows [R_W1B, R_W1B+4nv) hold, for the 4 input positions of pair i,
    # the weights of BOTH the even (cols 0:C1) and odd (cols C1:2C1) conv1
    # outputs of that pair.
    w1big = slab_ref[R_W1B:R_W1B + 4 * nv, 0:2 * C1]
    y1 = jnp.dot(x, w1big, preferred_element_type=f32)          # (n, 2*C1)

    # Even output p=2i also taps input 4i-1 = last slot of pair i-1.  The tap
    # weight is pre-padded to (4nv, C1) (zeros except last nv rows) so no lane
    # slicing of x is needed; the MXU is idle so the extra zero rows are free.
    w1t0 = slab_ref[R_W1T0:R_W1T0 + 4 * nv, 0:C1]
    z0 = jnp.dot(x, w1t0, preferred_element_type=f32)           # (n, C1)
    tap0 = jnp.concatenate([jnp.zeros((B, C1), f32), z0[:n - B, :]], axis=0)

    b1 = slab_ref[R_B1:R_B1 + 1, 0:C1]
    e = jnp.maximum(y1[:, 0:C1] + tap0 + b1, 0.0)   # conv1 even positions 2i
    o = jnp.maximum(y1[:, C1:2 * C1] + b1, 0.0)     # conv1 odd positions 2i+1
    if L1 % 2 == 1:
        # Position 2*(L2-1)+1 == L1 is conv2's right zero padding, not a real
        # conv1 output: zero those rows (compile-time branch; no mask input).
        o = jnp.concatenate([o[:n - B, :], jnp.zeros((B, C1), f32)], axis=0)

    # ---- conv2 (k=3, s=2, p=1): three accumulated matmuls, no lane concats --
    w2lo = slab_ref[R_W2LO:R_W2LO + C1, 0:C2]     # tap t=0 -> previous odd pos
    w2mid = slab_ref[R_W2MID:R_W2MID + C1, 0:C2]  # tap t=1 -> even pos
    w2hi = slab_ref[R_W2HI:R_W2HI + C1, 0:C2]     # tap t=2 -> odd pos
    b2 = slab_ref[R_B2:R_B2 + 1, 0:C2]

    ylo = jnp.dot(o, w2lo, preferred_element_type=f32)
    ylo = jnp.concatenate([jnp.zeros((B, C2), f32), ylo[:n - B, :]], axis=0)
    h2 = (jnp.dot(e, w2mid, preferred_element_type=f32)
          + jnp.dot(o, w2hi, preferred_element_type=f32)
          + ylo + b2)
    h2 = jnp.maximum(h2, 0.0)                                    # (n, C2)
    # TODO(synk): training-mode Dropout(0.1) mask not applied (eval semantics).

    # ---- fc1 + sigmoid: per-position (B, C2) MAC, then ONE lane reduction ---
    acc = h2[0:B, :] * slab_ref[R_FCW:R_FCW + 1, 0:C2]
    for l in range(1, L2):                          # static unroll, L2 tiny
        acc = acc + h2[l * B:(l + 1) * B, :] * slab_ref[R_FCW + l:R_FCW + l + 1, 0:C2]
    fcb = slab_ref[R_FCB:R_FCB + 1, 0:1]
    logit = jnp.sum(acc, axis=1, keepdims=True) + fcb            # (B, 1)
    out_ref[...] = jax.nn.sigmoid(logit)


def prepare_cnn1d_params(params, input_shape):
    """One-time parameter packing (runs OUTSIDE the per-call forward path)."""
    seq_len, n_vars = input_shape
    w1, b1, w2, b2, fcw, fcb = [np.asarray(p, np.float32) for p in params]
    C1, nv = w1.shape[0], w1.shape[1]
    C2 = w2.shape[0]
    assert nv == n_vars
    L1 = (seq_len + 1) // 2
    L2 = (L1 + 1) // 2

    lanes = max(2 * C1, C2)
    R_W1B = 0
    R_W1T0 = _align8(R_W1B + 4 * nv)
    R_B1 = _align8(R_W1T0 + 4 * nv)
    R_W2LO = _align8(R_B1 + 1)
    R_W2MID = _align8(R_W2LO + C1)
    R_W2HI = _align8(R_W2MID + C1)
    R_B2 = _align8(R_W2HI + C1)
    R_FCW = _align8(R_B2 + 1)
    R_FCB = _align8(R_FCW + L2)
    rows = _align8(R_FCB + 1)
    offs = (R_W1B, R_W1T0, R_B1, R_W2LO, R_W2MID, R_W2HI, R_B2, R_FCW, R_FCB)

    slab = np.zeros((rows, lanes), np.float32)
    w1_t = [w1[:, :, t].T for t in range(3)]        # each (nv, C1)
    # Combined conv1 weight: even-output cols 0:C1, odd-output cols C1:2*C1.
    slab[R_W1B + 0 * nv:R_W1B + 1 * nv, 0:C1] = w1_t[1]
    slab[R_W1B + 1 * nv:R_W1B + 2 * nv, 0:C1] = w1_t[2]
    slab[R_W1B + 1 * nv:R_W1B + 2 * nv, C1:2 * C1] = w1_t[0]
    slab[R_W1B + 2 * nv:R_W1B + 3 * nv, C1:2 * C1] = w1_t[1]
    slab[R_W1B + 3 * nv:R_W1B + 4 * nv, C1:2 * C1] = w1_t[2]
    # Zero-padded tap-0 weight for the even outputs (only last nv rows used).
    slab[R_W1T0 + 3 * nv:R_W1T0 + 4 * nv, 0:C1] = w1_t[0]
    slab[R_B1, 0:C1] = b1
    w2_t = [w2[:, :, t].T for t in range(3)]        # each (C1, C2)
    slab[R_W2LO:R_W2LO + C1, 0:C2] = w2_t[0]
    slab[R_W2MID:R_W2MID + C1, 0:C2] = w2_t[1]
    slab[R_W2HI:R_W2HI + C1, 0:C2] = w2_t[2]
    slab[R_B2, 0:C2] = b2
    # torch flattens (C2, L2) as c*L2 + l -> per-position rows (L2, C2).
    slab[R_FCW:R_FCW + L2, 0:C2] = fcw.reshape(C2, L2).T
    slab[R_FCB, 0] = fcb.reshape(-1)[0]

    return dict(slab=jnp.asarray(slab), seq_len=seq_len, n_vars=nv,
                C1=C1, C2=C2, L1=L1, L2=L2, offs=offs)


def cnn_model_1d_forward(x, prep):
    """x: (B0, B1, seq_len, n_vars) as in the torch forward. Returns (B0*B1, 1)."""
    B = x.shape[0] * x.shape[1]
    seq_len, nv = x.shape[2], x.shape[3]
    L1, L2 = prep['L1'], prep['L2']
    C1, C2 = prep['C1'], prep['C2']
    K1 = 4 * nv
    n = B * L2

    xb = x.reshape(B, seq_len, nv).astype(jnp.float32)
    if 4 * L2 != seq_len:                     # compile-time; no-op when seq_len % 4 == 0
        xb = jnp.pad(xb, ((0, 0), (0, 4 * L2 - seq_len), (0, 0)))
    # Position-major pair rows (row = pair_index*B + b): the ONLY per-call
    # layout op; everything else was packed once in prepare_cnn1d_params.
    x_rows = jnp.transpose(xb.reshape(B, L2, K1), (1, 0, 2)).reshape(n, K1)

    kernel = functools.partial(
        _cnn1d_kernel, B=B, L2=L2, L1=L1, nv=nv, C1=C1, C2=C2, offs=prep['offs'])

    slab = prep['slab']
    return pl.pallas_call(
        kernel,
        out_shape=jax.ShapeDtypeStruct((B, 1), jnp.float32),
        grid=(1,),
        in_specs=[pl.BlockSpec((n, K1), lambda i: (0, 0)),
                  pl.BlockSpec(slab.shape, lambda i: (0, 0))],
        out_specs=pl.BlockSpec((B, 1), lambda i: (0, 0)),
        compiler_params=pltpu.CompilerParams(dimension_semantics=("arbitrary",)),
    )(x_rows, slab)


if __name__ == "__main__":
    key = jax.random.PRNGKey(0)
    ks = jax.random.split(key, 8)

    seq_len, n_vars = 16, 4
    C1, C2 = 16, 32
    L1 = (seq_len + 1) // 2
    L2 = (L1 + 1) // 2

    x = jax.random.normal(ks[0], (2, 2, seq_len, n_vars), jnp.float32)

    def u(k, shape, fan_in):
        b = 1.0 / float(np.sqrt(fan_in))
        return jax.random.uniform(k, shape, jnp.float32, -b, b)

    w1 = u(ks[1], (C1, n_vars, 3), n_vars * 3)     # torch Conv1d weight (O, I, K)
    b1 = u(ks[2], (C1,), n_vars * 3)
    w2 = u(ks[3], (C2, C1, 3), C1 * 3)
    b2 = u(ks[4], (C2,), C1 * 3)
    fcw = u(ks[5], (1, C2 * L2), C2 * L2)          # torch Linear weight (1, 32*L2)
    fcb = u(ks[6], (1,), C2 * L2)
    params = (w1, b1, w2, b2, fcw, fcb)

    prep = prepare_cnn1d_params(params, (seq_len, n_vars))   # one-time packing
    fwd = jax.jit(lambda xx: cnn_model_1d_forward(xx, prep))

    out = jax.block_until_ready(fwd(x))
    assert out.shape == (4, 1)

    # Pure-JAX reference mirroring the PyTorch forward (eval mode).
    xr = x.reshape(-1, seq_len, n_vars).transpose(0, 2, 1)            # (B, C, L)

    def conv1d(z, w, b, stride):
        y = lax.conv_general_dilated(z, w, (stride,), [(1, 1)],
                                     dimension_numbers=('NCH', 'OIH', 'NCH'))
        return y + b[None, :, None]

    h = jnp.maximum(conv1d(xr, w1, b1, 2), 0.0)
    h = jnp.maximum(conv1d(h, w2, b2, 2), 0.0)
    ref = jax.nn.sigmoid(h.reshape(h.shape[0], -1) @ fcw.T + fcb[None, :])

    np.testing.assert_allclose(np.asarray(out), np.asarray(ref), rtol=2e-3, atol=2e-3)
    print("KERNEL_OK")
</pallas_src>

<mosaic_0001>
module attributes {stable_mosaic.version = 11 : i64} {
  func.func @_cnn1d_kernel(%arg0: i32, %arg1: memref<16x16xf32, #tpu.memory_space<vmem>>, %arg2: memref<112x32xf32, #tpu.memory_space<vmem>>, %arg3: memref<4x1xf32, #tpu.memory_space<vmem>>) attributes {dimension_semantics = [#tpu.dimension_semantics<arbitrary>], iteration_bounds = array<i64: 1>, scalar_prefetch = 0 : i64, scratch_operands = 0 : i64, tpu.core_type = #tpu.core_type<tc>, window_params = [{pipeline_mode = #tpu.pipeline_mode<synchronous>, transform_indices = @transform_0, window_bounds = array<i64: 16, 16>}, {pipeline_mode = #tpu.pipeline_mode<synchronous>, transform_indices = @transform_1, window_bounds = array<i64: 112, 32>}, {pipeline_mode = #tpu.pipeline_mode<synchronous>, transform_indices = @transform_2, window_bounds = array<i64: 4, 1>}]} {
    %c0 = arith.constant 0 : index
    %c0_0 = arith.constant 0 : index
    %0 = vector.load %arg1[%c0, %c0_0] : memref<16x16xf32, #tpu.memory_space<vmem>>, vector<16x16xf32>
    %c0_1 = arith.constant 0 : index
    %c0_2 = arith.constant 0 : index
    %1 = vector.load %arg2[%c0_1, %c0_2] : memref<112x32xf32, #tpu.memory_space<vmem>>, vector<16x32xf32>
    %cst = arith.constant dense<0.000000e+00> : vector<16x32xf32>
    %2 = tpu.matmul %0, %1, %cst {dimension_numbers = #tpu.dot_dimension_numbers<[1], [0], [0], [1], [0, 0, 1, 1], [], []>} : vector<16x16xf32>, vector<16x32xf32>, vector<16x32xf32> -> vector<16x32xf32>
    %c16 = arith.constant 16 : index
    %c0_3 = arith.constant 0 : index
    %3 = vector.load %arg2[%c16, %c0_3] : memref<112x32xf32, #tpu.memory_space<vmem>>, vector<16x16xf32>
    %cst_4 = arith.constant dense<0.000000e+00> : vector<16x16xf32>
    %4 = tpu.matmul %0, %3, %cst_4 {dimension_numbers = #tpu.dot_dimension_numbers<[1], [0], [0], [1], [0, 0, 1, 1], [], []>} : vector<16x16xf32>, vector<16x16xf32>, vector<16x16xf32> -> vector<16x16xf32>
    %cst_5 = arith.constant 0.000000e+00 : f32
    %5 = vector.broadcast %cst_5 : f32 to vector<4x16xf32>
    %6 = vector.extract_strided_slice %4 {offsets = [0, 0], sizes = [12, 16], strides = [1, 1]} : vector<16x16xf32> to vector<12x16xf32>
    %7 = tpu.concatenate %5, %6 in 0 : vector<4x16xf32>, vector<12x16xf32> -> vector<16x16xf32>
    %c32 = arith.constant 32 : index
    %c0_6 = arith.constant 0 : index
    %8 = vector.load %arg2[%c32, %c0_6] : memref<112x32xf32, #tpu.memory_space<vmem>>, vector<1x16xf32>
    %9 = vector.extract_strided_slice %2 {offsets = [0, 0], sizes = [16, 16], strides = [1, 1]} : vector<16x32xf32> to vector<16x16xf32>
    %10 = arith.addf %9, %7 : vector<16x16xf32>
    %11 = vector.broadcast %8 : vector<1x16xf32> to vector<16x16xf32>
    %12 = arith.addf %10, %11 : vector<16x16xf32>
    %cst_7 = arith.constant 0.000000e+00 : f32
    %13 = vector.broadcast %cst_7 : f32 to vector<16x16xf32>
    %14 = arith.maximumf %12, %13 : vector<16x16xf32>
    %15 = vector.extract_strided_slice %2 {offsets = [0, 16], sizes = [16, 16], strides = [1, 1]} : vector<16x32xf32> to vector<16x16xf32>
    %16 = vector.broadcast %8 : vector<1x16xf32> to vector<16x16xf32>
    %17 = arith.addf %15, %16 : vector<16x16xf32>
    %cst_8 = arith.constant 0.000000e+00 : f32
    %18 = vector.broadcast %cst_8 : f32 to vector<16x16xf32>
    %19 = arith.maximumf %17, %18 : vector<16x16xf32>
    %c40 = arith.constant 40 : index
    %c0_9 = arith.constant 0 : index
    %20 = vector.load %arg2[%c40, %c0_9] : memref<112x32xf32, #tpu.memory_space<vmem>>, vector<16x32xf32>
    %c56 = arith.constant 56 : index
    %c0_10 = arith.constant 0 : index
    %21 = vector.load %arg2[%c56, %c0_10] : memref<112x32xf32, #tpu.memory_space<vmem>>, vector<16x32xf32>
    %c72 = arith.constant 72 : index
    %c0_11 = arith.constant 0 : index
    %22 = vector.load %arg2[%c72, %c0_11] : memref<112x32xf32, #tpu.memory_space<vmem>>, vector<16x32xf32>
    %c88 = arith.constant 88 : index
    %c0_12 = arith.constant 0 : index
    %23 = vector.load %arg2[%c88, %c0_12] : memref<112x32xf32, #tpu.memory_space<vmem>>, vector<1x32xf32>
    %cst_13 = arith.constant dense<0.000000e+00> : vector<16x32xf32>
    %24 = tpu.matmul %19, %20, %cst_13 {dimension_numbers = #tpu.dot_dimension_numbers<[1], [0], [0], [1], [0, 0, 1, 1], [], []>} : vector<16x16xf32>, vector<16x32xf32>, vector<16x32xf32> -> vector<16x32xf32>
    %cst_14 = arith.constant 0.000000e+00 : f32
    %25 = vector.broadcast %cst_14 : f32 to vector<4x32xf32>
    %26 = vector.extract_strided_slice %24 {offsets = [0, 0], sizes = [12, 32], strides = [1, 1]} : vector<16x32xf32> to vector<12x32xf32>
    %27 = tpu.concatenate %25, %26 in 0 : vector<4x32xf32>, vector<12x32xf32> -> vector<16x32xf32>
    %cst_15 = arith.constant dense<0.000000e+00> : vector<16x32xf32>
    %28 = tpu.matmul %14, %21, %cst_15 {dimension_numbers = #tpu.dot_dimension_numbers<[1], [0], [0], [1], [0, 0, 1, 1], [], []>} : vector<16x16xf32>, vector<16x32xf32>, vector<16x32xf32> -> vector<16x32xf32>
    %cst_16 = arith.constant dense<0.000000e+00> : vector<16x32xf32>
    %29 = tpu.matmul %19, %22, %cst_16 {dimension_numbers = #tpu.dot_dimension_numbers<[1], [0], [0], [1], [0, 0, 1, 1], [], []>} : vector<16x16xf32>, vector<16x32xf32>, vector<16x32xf32> -> vector<16x32xf32>
    %30 = arith.addf %28, %29 : vector<16x32xf32>
    %31 = arith.addf %30, %27 : vector<16x32xf32>
    %32 = vector.broadcast %23 : vector<1x32xf32> to vector<16x32xf32>
    %33 = arith.addf %31, %32 : vector<16x32xf32>
    %cst_17 = arith.constant 0.000000e+00 : f32
    %34 = vector.broadcast %cst_17 : f32 to vector<16x32xf32>
    %35 = arith.maximumf %33, %34 : vector<16x32xf32>
    %36 = vector.extract_strided_slice %35 {offsets = [0, 0], sizes = [4, 32], strides = [1, 1]} : vector<16x32xf32> to vector<4x32xf32>
    %c96 = arith.constant 96 : index
    %c0_18 = arith.constant 0 : index
    %37 = vector.load %arg2[%c96, %c0_18] : memref<112x32xf32, #tpu.memory_space<vmem>>, vector<1x32xf32>
    %38 = vector.broadcast %37 : vector<1x32xf32> to vector<4x32xf32>
    %39 = arith.mulf %36, %38 : vector<4x32xf32>
    %40 = vector.extract_strided_slice %35 {offsets = [4, 0], sizes = [4, 32], strides = [1, 1]} : vector<16x32xf32> to vector<4x32xf32>
    %c97 = arith.constant 97 : index
    %c0_19 = arith.constant 0 : index
    %41 = vector.load %arg2[%c97, %c0_19] : memref<112x32xf32, #tpu.memory_space<vmem>>, vector<1x32xf32>
    %42 = vector.broadcast %41 : vector<1x32xf32> to vector<4x32xf32>
    %43 = arith.mulf %40, %42 : vector<4x32xf32>
    %44 = arith.addf %39, %43 : vector<4x32xf32>
    %45 = vector.extract_strided_slice %35 {offsets = [8, 0], sizes = [4, 32], strides = [1, 1]} : vector<16x32xf32> to vector<4x32xf32>
    %c98 = arith.constant 98 : index
    %c0_20 = arith.constant 0 : index
    %46 = vector.load %arg2[%c98, %c0_20] : memref<112x32xf32, #tpu.memory_space<vmem>>, vector<1x32xf32>
    %47 = vector.broadcast %46 : vector<1x32xf32> to vector<4x32xf32>
    %48 = arith.mulf %45, %47 : vector<4x32xf32>
    %49 = arith.addf %44, %48 : vector<4x32xf32>
    %50 = vector.extract_strided_slice %35 {offsets = [12, 0], sizes = [4, 32], strides = [1, 1]} : vector<16x32xf32> to vector<4x32xf32>
    %c99 = arith.constant 99 : index
    %c0_21 = arith.constant 0 : index
    %51 = vector.load %arg2[%c99, %c0_21] : memref<112x32xf32, #tpu.memory_space<vmem>>, vector<1x32xf32>
    %52 = vector.broadcast %51 : vector<1x32xf32> to vector<4x32xf32>
    %53 = arith.mulf %50, %52 : vector<4x32xf32>
    %54 = arith.addf %49, %53 : vector<4x32xf32>
    %c104 = arith.constant 104 : index
    %c0_22 = arith.constant 0 : index
    %55 = vector.load %arg2[%c104, %c0_22] : memref<112x32xf32, #tpu.memory_space<vmem>>, vector<1x1xf32>
    %cst_23 = arith.constant dense<0.000000e+00> : vector<4xf32>
    %56 = vector.multi_reduction <add>, %54, %cst_23 [1] : vector<4x32xf32> to vector<4xf32>
    %57 = vector.shape_cast %56 : vector<4xf32> to vector<4x1xf32>
    %58 = vector.broadcast %55 : vector<1x1xf32> to vector<4x1xf32>
    %59 = arith.addf %57, %58 : vector<4x1xf32>
    %60 = arith.negf %59 : vector<4x1xf32>
    %61 = math.exp %60 : vector<4x1xf32>
    %cst_24 = arith.constant 1.000000e+00 : f32
    %62 = vector.broadcast %cst_24 : f32 to vector<4x1xf32>
    %63 = arith.addf %62, %61 : vector<4x1xf32>
    %64 = arith.divf %62, %63 : vector<4x1xf32>
    %c0_25 = arith.constant 0 : index
    %c0_26 = arith.constant 0 : index
    %65 = vector.load %arg3[%c0_25, %c0_26] : memref<4x1xf32, #tpu.memory_space<vmem>>, vector<4x1xf32>
    tpu.vector_store %arg3[%c0_25, %c0_26], %64 {strides = array<i32>} : memref<4x1xf32, #tpu.memory_space<vmem>>, vector<4x1xf32>,
    return
  }
  func.func @transform_0(%arg0: i32) -> (i32, i32) {
    %c0_i32 = arith.constant 0 : i32
    %c0_i32_0 = arith.constant 0 : i32
    %c0_i32_1 = arith.constant 0 : i32
    return %c0_i32, %c0_i32_0 : i32, i32
  }
  func.func @transform_1(%arg0: i32) -> (i32, i32) {
    %c0_i32 = arith.constant 0 : i32
    %c0_i32_0 = arith.constant 0 : i32
    %c0_i32_1 = arith.constant 0 : i32
    return %c0_i32, %c0_i32_0 : i32, i32
  }
  func.func @transform_2(%arg0: i32) -> (i32, i32) {
    %c0_i32 = arith.constant 0 : i32
    %c0_i32_0 = arith.constant 0 : i32
    %c0_i32_1 = arith.constant 0 : i32
    return %c0_i32, %c0_i32_0 : i32, i32
  }
}

</mosaic_0001>

<bundles_post_ra>
// kernel: _lambda_.1
= control target key start
LH: loop header
LB: loop body
LE: loop exit
PB: predicated region body
PF: predicated region fallthrough
CT: control target
= control target key end

     0   :  { %vm15_vm0 = vcmask 130048   ;;  %s624_s21 = smov 16   ;;  %vm176_vm1 = vcmask 1043456   ;;  %s625_s7 = smov 112   ;;  %vm502_vm2 = vcmask 257024   ;;  %vm517_vm3 = vcmask 3072   ;;  %s715_s1 = inlined_call_operand.vmem [shape: f32[112,32], index: 1, kind: input, shape index: {}]   ;;  %s716_s0 = inlined_call_operand.vmem [shape: f32[16,16], index: 0, kind: input, shape index: {}]   ;;  %s717_s2 = inlined_call_operand.vmem [shape: f32[4,1], index: 2, kind: output, shape index: {}]  }
   0x1   :  { %v13_v0 = vld [vmem:[%s715_s1] sm:$0xff]  ;;  %v14_v1 = vld [vmem:[%s715_s1 + $0x8] sm:$0xff]  ;;  %v97_v2 = vld [vmem:[%s715_s1 + $0x10] sm:$0xff] }
   0x2   :  { %v596_v3 = vpack.c.bf16 %v14_v1, %v13_v0  ;;  %v98_v4 = vld [vmem:[%s715_s1 + $0x18] sm:$0xff]  ;;  %v11_v5 = vld [vmem:[%s716_s0] sm:$0xff]  ;;  %v12_v8 = vld [vmem:[%s716_s0 + $0x8] sm:$0xff] }
   0x3   :  { %v600_v6 = vpack.c.bf16 %v98_v4, %v97_v2  ;;  %565 = vmatprep.mubr.msk.f32.mxu0 %vm15_vm0, %v11_v5  ;;  %572 = vmatprep.mubr.msk.f32.mxu1 %vm15_vm0, %v11_v5  ;;  %v527_v7 = vld [vmem:[%s715_s1 + $0x20] ss:$0 sm:$0xff]  ;;  %v206_v9 = vld [vmem:[%s715_s1 + $0x48] sm:$0xff]  ;;  %v207_v10 = vld [vmem:[%s715_s1 + $0x50] sm:$0xff] }
   0x4   :  { %597 = vmatprep.subr.bf16.mxu0 %v596_v3  ;;  %195 = vrot.lane.b32.xlu0 %v527_v7, %s624_s21  ;;  %v202_v11 = vld [vmem:[%s715_s1 + $0x28] sm:$0xff]  ;;  %v608_v12 = vpack.c.bf16 %v207_v10, %v206_v9  ;;  %v203_v13 = vld [vmem:[%s715_s1 + $0x30] sm:$0xff]  ;;  %v204_v15 = vld [vmem:[%s715_s1 + $0x38] sm:$0xff] }
   0x5   :  { %601 = vmatprep.subr.bf16.mxu1 %v600_v6  ;;  %599 = vmatpush3.bf16.msra.mxu0 %v596_v3  ;;  %v604_v14 = vpack.c.bf16 %v203_v13, %v202_v11  ;;  %v205_v16 = vld [vmem:[%s715_s1 + $0x40] sm:$0xff]  ;;  %v534_v44 = vld [vmem:[%s715_s1 + $0x58] ss:$0 sm:$0xff]  ;;  %v539_v4 = vld [vmem:[%s715_s1 + $0x68] ss:$0 sm:$0xff] }
   0x6   :  { %603 = vmatpush3.bf16.msra.mxu1 %v600_v6  ;;  %v612_v17 = vpack.c.bf16 %v205_v16, %v204_v15  ;;  %v536_v52 = vld [vmem:[%s715_s1 + $0x61] ss:$0 sm:$0xff]  ;;  %v535_v55 = vld [vmem:[%s715_s1 + $0x60] ss:$0 sm:$0xff]  ;;  %v538_v56 = vld [vmem:[%s715_s1 + $0x63] ss:$0 sm:$0xff] }
   0x7   :  { %609 = vmatprep.subr.bf16.mxu1 %v608_v12  ;;  %605 = vmatprep.subr.bf16.mxu0 %v604_v14  ;;  %v537_v58 = vld [vmem:[%s715_s1 + $0x62] ss:$0 sm:$0xff] }
   0x8   :  { %566 = vmatmul.mubr.msk.f32.vlgmr.msra.gmra.mrb[0].mxu0 %vm15_vm0, %v12_v8 }
   0x9   :  { %573 = vmatmul.mubr.msk.f32.vlgmr.msra.gmra.mrb[0].mxu1 %vm15_vm0, %v12_v8  ;;  %607 = vmatpush3.bf16.msra.mxu0 %v604_v14 }
   0xa   :  { %611 = vmatpush3.bf16.msra.mxu1 %v608_v12 }
   0xb   :  { %613 = vmatprep.subr.bf16.mxu1 %v612_v17 }
  0x76   :  { %v196_v18 = vpop.permute.xlu0 %195 }
  0xdb   :  { %v567_v19 = vpop.f32.mrb[0].mxu0 }
  0xdc   :  { %v199_v20 = vadd.f32 %v567_v19, %v196_v18  ;;  %v574_v21 = vpop.f32.mrb[0].mxu1  ;;  %v88_v22 = vpop.f32.mrb[1].mxu0 }
  0xdd   :  { %v178_v23 = vrot.slane %v574_v21, 4  ;;  %v198_v24 = vadd.f32 %v196_v18, %v88_v22  ;;  %v165_v25 = vpop.f32.mrb[1].mxu1 }
  0xde   :  { %v177_v26 = vrot.slane %v165_v25, 4  ;;  %v201_v27 = vmax.f32 %v199_v20, 0.0 }
  0xdf   :  { %v200_v28 = vmax.f32 %v198_v24, 0.0 }
  0xe0   :  { %v179_v29 = vsel %vm176_vm1, %v177_v26, %v178_v23  ;;  %v182_v30 = vsel %vm176_vm1, 0.0, %v177_v26  ;;  %213 = vrot.lane.b32.xlu1 %v201_v27, %s625_s7 }
  0xe1   :  { %v184_v31 = vadd.f32 %v182_v30, %v88_v22  ;;  %v185_v32 = vadd.f32 %v567_v19, %v179_v29  ;;  %211 = vrot.lane.b32.xlu0 %v200_v28, %s625_s7 }
  0xe3   :  { %v190_v33 = vadd.f32 %v527_v7, %v184_v31  ;;  %v191_v37 = vadd.f32 %v527_v7, %v185_v32 }
  0xe5   :  { %v192_v35 = vmax.f32 %v190_v33, 0.0  ;;  %v193_v38 = vmax.f32 %v191_v37, 0.0 }
 0x152   :  { %v214_v36 = vpop.permute.xlu1 %213 }
 0x153   :  { %v212_v34 = vpop.permute.xlu0 %211 }
 0x154   :  { %579 = vmatprep.mubr.msk.f32.mxu0 %vm15_vm0, %v212_v34  ;;  %586 = vmatprep.mubr.msk.f32.mxu1 %vm15_vm0, %v212_v34 }
 0x155   :  { %580 = vmatmul.mubr.msk.f32.vlgmr.msra.gmra.mrb[2].mxu0 %vm15_vm0, %v214_v36  ;;  %587 = vmatmul.mubr.msk.f32.vlgmr.msra.gmra.mrb[2].mxu1 %vm15_vm0, %v214_v36 }
 0x156   :  { %615 = vmatpush3.bf16.msra.mxu1 %v612_v17  ;;  %593 = vmatprep.mubr.msk.f32.mxu1 %vm15_vm0, %v192_v35 }
 0x15d   :  { %594 = vmatmul.mubr.msk.f32.vlgmr.msra.gmra.mrb[2].mxu1 %vm15_vm0, %v193_v38 }
 0x228   :  { %v581_v39 = vpop.f32.mrb[2].mxu0 }
 0x229   :  { %v297_v40 = vrot.slane %v581_v39, 4  ;;  %v285_v41 = vpop.f32.mrb[3].mxu0 }
 0x22a   :  { %v296_v42 = vrot.slane %v285_v41, 4 }
 0x22c   :  { %v298_v43 = vsel %vm176_vm1, %v296_v42, %v297_v40  ;;  %v301_v47 = vsel %vm176_vm1, 0.0, %v296_v42 }
 0x230   :  { %v595_v45 = vpop.f32.mrb[2].mxu1 }
 0x231   :  { %v459_v46 = vadd.f32 %v595_v45, %v298_v43  ;;  %v449_v48 = vpop.f32.mrb[3].mxu1 }
 0x232   :  { %v458_v49 = vadd.f32 %v449_v48, %v301_v47 }
 0x233   :  { %v465_v50 = vadd.f32 %v534_v44, %v459_v46 }
 0x234   :  { %v464_v51 = vadd.f32 %v534_v44, %v458_v49 }
 0x235   :  { %v467_v53 = vmax.f32 %v465_v50, 0.0 }
 0x236   :  { %v466_v54 = vmax.f32 %v464_v51, 0.0 }
 0x237   :  { %v496_v61 = vmul.f32 %v538_v56, %v467_v53  ;;  %v489_v62 = vmul.f32 %v537_v58, %v467_v53 }
 0x238   :  { %v479_v57 = vmul.f32 %v536_v52, %v466_v54  ;;  %v473_v59 = vmul.f32 %v535_v55, %v466_v54 }
 0x239   :  { %v498_v1 = vrot.slane %v496_v61, 4 }
 0x23a   :  { %v481_v60 = vrot.slane %v479_v57, 4 }
 0x23c   :  { %v483_v63 = vadd.f32 %v481_v60, %v473_v59 }
 0x23e   :  { %v490_v0 = vadd.f32 %v489_v62, %v483_v63 }
 0x240   :  { %v500_v2 = vadd.f32 %v498_v1, %v490_v0 }
 0x242   :  { %v503_v3 = vsel %vm502_vm2, %v500_v2, 0.0 }
 0x243   :  { %504 = vadd.xlane.f32.xlu1 %v503_v3 }
 0x2d0   :  { %v505_v5 = vpop.xlane.xlu1 %504 }
 0x2d1   :  { %v510_v6 = vadd.f32 %v539_v4, %v505_v5 }
 0x2d3   :  { %v540_v7 = vmul.f32 -1.442695, %v510_v6 }
 0x2d5   :  { %620 = vpow2.f32 %v540_v7 }
 0x2df   :  { %v621_v8 = vpop.eup %620 }
 0x2e0   :  { %v514_v9 = vadd.f32 1.0, %v621_v8 }
 0x2e2   :  { %622 = vrcp.f32 %v514_v9 }
 0x2ec   :  { %v623_v10 = vpop.eup %622 }
 0x2ed   :  { %518 = vst.msk [vmem:[%s717_s2] sm:$0xf] %vm517_vm3, %v623_v10 }

</bundles_post_ra>
